<compile_context>
chip_gen: v7x
topology: tpu7x:2x2x1
jax: 0.10.0
libtpu: 0.0.40
codegen_flags: <defaults>
</compile_context>

<pallas_src>
import math

import jax
import jax.numpy as jnp
import numpy as np
from jax.experimental import pallas as pl
from jax.experimental.pallas import tpu as pltpu


def _round_up(x, m):
    return ((x + m - 1) // m) * m


def _make_kernel(n_valid, tile_n, has_mask):
    """Build the fused kernel, closed over static N / tile size / mask flag."""
    needs_row_mask = (n_valid % tile_n) != 0     # padded rows exist in last tile
    inv_sqrt2 = 1.0 / math.sqrt(2.0)             # python float -> jaxpr literal

    def kernel(*refs):
        if has_mask:
            (x_ref, mask_ref, w1_ref, b1_ref, g_ref, be_ref, w2_ref, b2_ref,
             out_ref, m_sc, l_sc, acc_sc) = refs
        else:
            (x_ref, w1_ref, b1_ref, g_ref, be_ref, w2_ref, b2_ref,
             out_ref, m_sc, l_sc, acc_sc) = refs
            mask_ref = None

        i = pl.program_id(0)

        @pl.when(i == 0)
        def _init():
            m_sc[...] = jnp.full_like(m_sc, -jnp.inf)
            l_sc[...] = jnp.zeros_like(l_sc)
            acc_sc[...] = jnp.zeros_like(acc_sc)

        x = x_ref[...]                                            # native dtype (tN, D)

        # Linear(in_dim, in_dim): native-dtype MXU matmul, f32 accumulation.
        h = jnp.dot(x, w1_ref[...], preferred_element_type=jnp.float32)
        h = h + b1_ref[...]

        # LayerNorm(in_dim), eps = 1e-5 (PyTorch default).
        mu = jnp.mean(h, axis=-1, keepdims=True)
        var = jnp.mean((h - mu) * (h - mu), axis=-1, keepdims=True)
        hn = (h - mu) * jax.lax.rsqrt(var + 1e-5)
        hn = hn * g_ref[...] + be_ref[...]

        # GELU (exact erf form — parity with PyTorch nn.GELU default).
        hg = 0.5 * hn * (1.0 + jax.lax.erf(hn * inv_sqrt2))

        # Linear(in_dim, 1): lane-axis reduce on the VPU/XLU instead of a
        # 1-column MXU matvec.  w2 is a (1, D) row; b2 is an SMEM scalar.
        s = jnp.sum(hg * w2_ref[...], axis=-1, keepdims=True) + b2_ref[0]   # (tN, 1)

        # leaky_relu (default negative_slope = 0.01).
        s = jnp.where(s >= 0.0, s, 0.01 * s)

        # Invalidate padded rows so they never enter the softmax statistics.
        if needs_row_mask:
            row = i * tile_n + jax.lax.broadcasted_iota(jnp.int32, (tile_n, 1), 0)
            s = jnp.where(row < n_valid, s, -jnp.inf)

        # Online softmax over the node axis (cross-tile reduction).
        m_tile = jnp.max(s, axis=0, keepdims=True)                # (1, 1)
        m_new = jnp.maximum(m_sc[...], m_tile)
        alpha = jnp.exp(m_sc[...] - m_new)
        p = jnp.exp(s - m_new)                                    # (tN, 1)
        l_sc[...] = alpha * l_sc[...] + jnp.sum(p, axis=0, keepdims=True)

        # Mask is applied AFTER softmax (not renormalized) — matches the module.
        if has_mask:
            p = p * mask_ref[...]

        # Weighted node-sum into a lane-dense (1, D) f32 scratch; p (f32) * x
        # promotes per-element on the VPU, no explicit f32 copy of x needed.
        acc_sc[...] = alpha * acc_sc[...] + jnp.sum(p * x, axis=0, keepdims=True)
        m_sc[...] = m_new

        @pl.when(i == pl.num_programs(0) - 1)
        def _finalize():
            out_ref[...] = (acc_sc[...] / l_sc[...]).astype(out_ref.dtype)

    return kernel


def node_attention_pooling(node_features, params, mask=None, *, tile_n=None):
    """node_features: (N, D); mask: optional (N,).  Returns (D,) pooled repr."""
    N, D = node_features.shape
    w1, b1, gamma, beta, w2, b2 = params

    # Empty graph: softmax over zero rows -> zero sum (matches torch semantics).
    if N == 0:
        return jnp.zeros((D,), jnp.float32)

    x_item = jnp.dtype(node_features.dtype).itemsize
    p_item = jnp.dtype(w1.dtype).itemsize

    # Generation-aware VMEM capacity (v7x: 64 MiB physical; v5e/v6e: 128 MiB).
    try:
        vmem_cap = int(pltpu.get_tpu_info().vmem_capacity_bytes)
    except Exception:
        vmem_cap = 64 << 20  # conservative fallback

    # Single-buffered resident parameters: w1 + four (1, D) rows.
    resident_bytes = p_item * (D * D + 4 * D)

    # Tile the node axis by byte budget: aim for ~1 MiB of x per tile, capped
    # so that up to 3-deep buffered x tiles + residents fit in ~half of VMEM.
    if tile_n is None:
        target_tile_bytes = 1 << 20
        tn = max(8, target_tile_bytes // (D * x_item))
        budget = max((vmem_cap // 2) - resident_bytes, 1 << 20)
        tn = min(tn, max(8, budget // (3 * D * x_item)))
    else:
        tn = tile_n
    tn = _round_up(min(tn, _round_up(N, 8)), 8)

    n_pad = _round_up(N, tn)
    num_tiles = n_pad // tn
    x_buf = 3 if num_tiles >= 3 else 2           # deeper pipelining when useful

    x_in = node_features
    if n_pad != N:
        x_in = jnp.pad(x_in, ((0, n_pad - N), (0, 0)))

    has_mask = mask is not None

    args = [x_in]
    in_specs = [pl.BlockSpec((tn, D), lambda i: (i, 0),
                             pipeline_mode=pl.Buffered(x_buf))]     # streamed
    if has_mask:
        m2 = mask.astype(jnp.float32).reshape(N, 1)
        if n_pad != N:
            m2 = jnp.pad(m2, ((0, n_pad - N), (0, 0)))
        args.append(m2)
        in_specs.append(pl.BlockSpec((tn, 1), lambda i: (i, 0),
                                     pipeline_mode=pl.Buffered(x_buf)))

    # Resident parameters: constant block index -> single-buffered.
    args += [
        w1,                      # (D, D)
        b1.reshape(1, D),
        gamma.reshape(1, D),
        beta.reshape(1, D),
        w2.reshape(1, D),        # second Linear weight as a lane-dense row
        b2.reshape(1),           # scalar bias -> SMEM
    ]
    in_specs += [
        pl.BlockSpec((D, D), lambda i: (0, 0), pipeline_mode=pl.Buffered(1)),
        pl.BlockSpec((1, D), lambda i: (0, 0), pipeline_mode=pl.Buffered(1)),
        pl.BlockSpec((1, D), lambda i: (0, 0), pipeline_mode=pl.Buffered(1)),
        pl.BlockSpec((1, D), lambda i: (0, 0), pipeline_mode=pl.Buffered(1)),
        pl.BlockSpec((1, D), lambda i: (0, 0), pipeline_mode=pl.Buffered(1)),
        pl.BlockSpec(memory_space=pltpu.MemorySpace.SMEM),
    ]

    out_spec = pl.BlockSpec((1, D), lambda i: (0, 0))

    # VMEM budget: buffered streamed tiles + single-buffered params + headroom.
    stream_bytes = x_buf * tn * D * x_item + (x_buf * tn * 4 if has_mask else 0)
    vmem_limit = int(min(vmem_cap,
                         max(16 << 20, stream_bytes + resident_bytes + (4 << 20))))

    kernel = _make_kernel(N, tn, has_mask)

    out = pl.pallas_call(
        kernel,
        out_shape=jax.ShapeDtypeStruct((1, D), jnp.float32),
        grid_spec=pltpu.PrefetchScalarGridSpec(
            num_scalar_prefetch=0,
            grid=(num_tiles,),
            in_specs=in_specs,
            out_specs=out_spec,
            scratch_shapes=[
                pltpu.VMEM((1, 1), jnp.float32),   # running max m
                pltpu.VMEM((1, 1), jnp.float32),   # running denom l
                pltpu.VMEM((1, D), jnp.float32),   # running weighted sum
            ],
        ),
        compiler_params=pltpu.CompilerParams(
            dimension_semantics=("arbitrary",),
            vmem_limit_bytes=vmem_limit,
        ),
    )(*args)
    return out[0]  # (D,)


def init_params(key, in_dim):
    """Deterministic init mirroring the shapes of the PyTorch module."""
    k1, k2, k3, k4 = jax.random.split(key, 4)
    bound1 = 1.0 / math.sqrt(in_dim)
    w1 = jax.random.uniform(k1, (in_dim, in_dim), jnp.float32, -bound1, bound1)
    b1 = jax.random.uniform(k2, (in_dim,), jnp.float32, -bound1, bound1)
    gamma = jnp.ones((in_dim,), jnp.float32)
    beta = jnp.zeros((in_dim,), jnp.float32)
    w2 = jax.random.uniform(k3, (in_dim, 1), jnp.float32, -bound1, bound1)
    b2 = jax.random.uniform(k4, (1,), jnp.float32, -bound1, bound1)
    return (w1, b1, gamma, beta, w2, b2)


def _reference(node_features, params, mask=None):
    """Pure-JAX reference of the PyTorch forward, for verification."""
    w1, b1, gamma, beta, w2, b2 = params
    h = node_features @ w1 + b1
    mu = jnp.mean(h, axis=-1, keepdims=True)
    var = jnp.mean((h - mu) ** 2, axis=-1, keepdims=True)
    hn = (h - mu) / jnp.sqrt(var + 1e-5) * gamma + beta
    hg = jax.nn.gelu(hn, approximate=False)
    scores = hg @ w2 + b2
    scores = jnp.where(scores >= 0, scores, 0.01 * scores)
    attn = jax.nn.softmax(scores, axis=0)
    if mask is not None:
        attn = attn * mask[:, None]
    return jnp.sum(attn * node_features, axis=0)


if __name__ == "__main__":
    key = jax.random.PRNGKey(0)
    k_x, k_m, k_p, k_x2, k_m2 = jax.random.split(key, 5)

    D = 32
    params = init_params(k_p, D)

    # Case 1: small graph, with mask (single tile).
    N1 = 8
    x1 = jax.random.normal(k_x, (N1, D), jnp.float32)
    mask1 = (jax.random.uniform(k_m, (N1,)) > 0.3).astype(jnp.float32)
    out1 = jax.block_until_ready(node_attention_pooling(x1, params, mask=mask1))
    ref1 = _reference(x1, params, mask=mask1)
    assert out1.shape == (D,)
    assert np.allclose(np.asarray(out1), np.asarray(ref1), rtol=1e-4, atol=1e-5)

    # Case 2: no mask (separate kernel variant, no dummy mask stream).
    out2 = jax.block_until_ready(node_attention_pooling(x1, params, mask=None))
    ref2 = _reference(x1, params, mask=None)
    assert np.allclose(np.asarray(out2), np.asarray(ref2), rtol=1e-4, atol=1e-5)

    # Case 3: multi-tile N with padding — exercises the online softmax path.
    N3 = 40
    x3 = jax.random.normal(k_x2, (N3, D), jnp.float32)
    mask3 = (jax.random.uniform(k_m2, (N3,)) > 0.3).astype(jnp.float32)
    out3 = jax.block_until_ready(
        node_attention_pooling(x3, params, mask=mask3, tile_n=16))
    ref3 = _reference(x3, params, mask=mask3)
    assert np.allclose(np.asarray(out3), np.asarray(ref3), rtol=1e-4, atol=1e-5)

    print("KERNEL_OK")
</pallas_src>

<mosaic_0001>
module attributes {stable_mosaic.version = 11 : i64} {
  func.func @kernel(%arg0: i32, %arg1: memref<8x32xf32, #tpu.memory_space<vmem>>, %arg2: memref<8x1xf32, #tpu.memory_space<vmem>>, %arg3: memref<32x32xf32, #tpu.memory_space<vmem>>, %arg4: memref<1x32xf32, #tpu.memory_space<vmem>>, %arg5: memref<1x32xf32, #tpu.memory_space<vmem>>, %arg6: memref<1x32xf32, #tpu.memory_space<vmem>>, %arg7: memref<1x32xf32, #tpu.memory_space<vmem>>, %arg8: memref<1xf32, #tpu.memory_space<smem>>, %arg9: memref<1x32xf32, #tpu.memory_space<vmem>>, %arg10: memref<1x1xf32, #tpu.memory_space<vmem>>, %arg11: memref<1x1xf32, #tpu.memory_space<vmem>>, %arg12: memref<1x32xf32, #tpu.memory_space<vmem>>) attributes {dimension_semantics = [#tpu.dimension_semantics<arbitrary>], iteration_bounds = array<i64: 1>, scalar_prefetch = 0 : i64, scratch_operands = 3 : i64, tpu.core_type = #tpu.core_type<tc>, window_params = [{pipeline_mode = #tpu.pipeline_mode<double_buffered>, transform_indices = @transform_0, window_bounds = array<i64: 8, 32>}, {pipeline_mode = #tpu.pipeline_mode<double_buffered>, transform_indices = @transform_1, window_bounds = array<i64: 8, 1>}, {pipeline_mode = #tpu.pipeline_mode<synchronous>, transform_indices = @transform_2, window_bounds = array<i64: 32, 32>}, {pipeline_mode = #tpu.pipeline_mode<synchronous>, transform_indices = @transform_3, window_bounds = array<i64: 1, 32>}, {pipeline_mode = #tpu.pipeline_mode<synchronous>, transform_indices = @transform_4, window_bounds = array<i64: 1, 32>}, {pipeline_mode = #tpu.pipeline_mode<synchronous>, transform_indices = @transform_5, window_bounds = array<i64: 1, 32>}, {pipeline_mode = #tpu.pipeline_mode<synchronous>, transform_indices = @transform_6, window_bounds = array<i64: 1, 32>}, {transform_indices = @transform_7, window_bounds = array<i64: 1>}, {pipeline_mode = #tpu.pipeline_mode<synchronous>, transform_indices = @transform_8, window_bounds = array<i64: 1, 32>}]} {
    %c0_i32 = arith.constant 0 : i32
    %0 = arith.cmpi eq, %arg0, %c0_i32 : i32
    %1 = arith.extui %0 : i1 to i32
    %c0_i32_0 = arith.constant 0 : i32
    %2 = arith.cmpi ne, %1, %c0_i32_0 : i32
    scf.if %2 {
      %cst_45 = arith.constant 0xFF800000 : f32
      %87 = vector.broadcast %cst_45 : f32 to vector<1x1xf32>
      %c0_46 = arith.constant 0 : index
      %c0_47 = arith.constant 0 : index
      %88 = vector.load %arg10[%c0_46, %c0_47] : memref<1x1xf32, #tpu.memory_space<vmem>>, vector<1x1xf32>
      tpu.vector_store %arg10[%c0_46, %c0_47], %87 {strides = array<i32>} : memref<1x1xf32, #tpu.memory_space<vmem>>, vector<1x1xf32>,
      %cst_48 = arith.constant 0.000000e+00 : f32
      %89 = vector.broadcast %cst_48 : f32 to vector<1x1xf32>
      %c0_49 = arith.constant 0 : index
      %c0_50 = arith.constant 0 : index
      %90 = vector.load %arg11[%c0_49, %c0_50] : memref<1x1xf32, #tpu.memory_space<vmem>>, vector<1x1xf32>
      tpu.vector_store %arg11[%c0_49, %c0_50], %89 {strides = array<i32>} : memref<1x1xf32, #tpu.memory_space<vmem>>, vector<1x1xf32>,
      %cst_51 = arith.constant 0.000000e+00 : f32
      %91 = vector.broadcast %cst_51 : f32 to vector<1x32xf32>
      %c0_52 = arith.constant 0 : index
      %c0_53 = arith.constant 0 : index
      %92 = vector.load %arg12[%c0_52, %c0_53] : memref<1x32xf32, #tpu.memory_space<vmem>>, vector<1x32xf32>
      tpu.vector_store %arg12[%c0_52, %c0_53], %91 {strides = array<i32>} : memref<1x32xf32, #tpu.memory_space<vmem>>, vector<1x32xf32>,
    } else {
    }
    %c0 = arith.constant 0 : index
    %c0_1 = arith.constant 0 : index
    %3 = vector.load %arg1[%c0, %c0_1] : memref<8x32xf32, #tpu.memory_space<vmem>>, vector<8x32xf32>
    %c0_2 = arith.constant 0 : index
    %c0_3 = arith.constant 0 : index
    %4 = vector.load %arg3[%c0_2, %c0_3] : memref<32x32xf32, #tpu.memory_space<vmem>>, vector<32x32xf32>
    %cst = arith.constant dense<0.000000e+00> : vector<8x32xf32>
    %5 = tpu.matmul %3, %4, %cst {dimension_numbers = #tpu.dot_dimension_numbers<[1], [0], [0], [1], [0, 0, 1, 1], [], []>} : vector<8x32xf32>, vector<32x32xf32>, vector<8x32xf32> -> vector<8x32xf32>
    %c0_4 = arith.constant 0 : index
    %c0_5 = arith.constant 0 : index
    %6 = vector.load %arg4[%c0_4, %c0_5] : memref<1x32xf32, #tpu.memory_space<vmem>>, vector<1x32xf32>
    %7 = vector.broadcast %6 : vector<1x32xf32> to vector<8x32xf32>
    %8 = arith.addf %5, %7 : vector<8x32xf32>
    %cst_6 = arith.constant dense<0.000000e+00> : vector<8xf32>
    %9 = vector.multi_reduction <add>, %8, %cst_6 [1] : vector<8x32xf32> to vector<8xf32>
    %10 = vector.shape_cast %9 : vector<8xf32> to vector<8x1xf32>
    %cst_7 = arith.constant 3.200000e+01 : f32
    %11 = vector.broadcast %cst_7 : f32 to vector<8x1xf32>
    %12 = arith.divf %10, %11 : vector<8x1xf32>
    %13 = vector.broadcast %12 : vector<8x1xf32> to vector<8x32xf32>
    %14 = arith.subf %8, %13 : vector<8x32xf32>
    %15 = vector.broadcast %12 : vector<8x1xf32> to vector<8x32xf32>
    %16 = arith.subf %8, %15 : vector<8x32xf32>
    %17 = arith.mulf %14, %16 : vector<8x32xf32>
    %cst_8 = arith.constant dense<0.000000e+00> : vector<8xf32>
    %18 = vector.multi_reduction <add>, %17, %cst_8 [1] : vector<8x32xf32> to vector<8xf32>
    %19 = vector.shape_cast %18 : vector<8xf32> to vector<8x1xf32>
    %cst_9 = arith.constant 3.200000e+01 : f32
    %20 = vector.broadcast %cst_9 : f32 to vector<8x1xf32>
    %21 = arith.divf %19, %20 : vector<8x1xf32>
    %22 = vector.broadcast %12 : vector<8x1xf32> to vector<8x32xf32>
    %23 = arith.subf %8, %22 : vector<8x32xf32>
    %cst_10 = arith.constant 9.99999974E-6 : f32
    %24 = vector.broadcast %cst_10 : f32 to vector<8x1xf32>
    %25 = arith.addf %21, %24 : vector<8x1xf32>
    %26 = math.rsqrt %25 : vector<8x1xf32>
    %27 = vector.broadcast %26 : vector<8x1xf32> to vector<8x32xf32>
    %28 = arith.mulf %23, %27 : vector<8x32xf32>
    %c0_11 = arith.constant 0 : index
    %c0_12 = arith.constant 0 : index
    %29 = vector.load %arg5[%c0_11, %c0_12] : memref<1x32xf32, #tpu.memory_space<vmem>>, vector<1x32xf32>
    %30 = vector.broadcast %29 : vector<1x32xf32> to vector<8x32xf32>
    %31 = arith.mulf %28, %30 : vector<8x32xf32>
    %c0_13 = arith.constant 0 : index
    %c0_14 = arith.constant 0 : index
    %32 = vector.load %arg6[%c0_13, %c0_14] : memref<1x32xf32, #tpu.memory_space<vmem>>, vector<1x32xf32>
    %33 = vector.broadcast %32 : vector<1x32xf32> to vector<8x32xf32>
    %34 = arith.addf %31, %33 : vector<8x32xf32>
    %cst_15 = arith.constant 5.000000e-01 : f32
    %35 = vector.broadcast %cst_15 : f32 to vector<8x32xf32>
    %36 = arith.mulf %35, %34 : vector<8x32xf32>
    %cst_16 = arith.constant 0.707106769 : f32
    %37 = vector.broadcast %cst_16 : f32 to vector<8x32xf32>
    %38 = arith.mulf %34, %37 : vector<8x32xf32>
    %39 = math.erf %38 : vector<8x32xf32>
    %cst_17 = arith.constant 1.000000e+00 : f32
    %40 = vector.broadcast %cst_17 : f32 to vector<8x32xf32>
    %41 = arith.addf %40, %39 : vector<8x32xf32>
    %42 = arith.mulf %36, %41 : vector<8x32xf32>
    %c0_18 = arith.constant 0 : index
    %c0_19 = arith.constant 0 : index
    %43 = vector.load %arg7[%c0_18, %c0_19] : memref<1x32xf32, #tpu.memory_space<vmem>>, vector<1x32xf32>
    %44 = vector.broadcast %43 : vector<1x32xf32> to vector<8x32xf32>
    %45 = arith.mulf %42, %44 : vector<8x32xf32>
    %cst_20 = arith.constant dense<0.000000e+00> : vector<8xf32>
    %46 = vector.multi_reduction <add>, %45, %cst_20 [1] : vector<8x32xf32> to vector<8xf32>
    %47 = vector.shape_cast %46 : vector<8xf32> to vector<8x1xf32>
    %c0_21 = arith.constant 0 : index
    %48 = memref.load %arg8[%c0_21] : memref<1xf32, #tpu.memory_space<smem>>
    %49 = vector.broadcast %48 : f32 to vector<8x1xf32>
    %50 = arith.addf %47, %49 : vector<8x1xf32>
    %cst_22 = arith.constant 0.000000e+00 : f32
    %51 = vector.broadcast %cst_22 : f32 to vector<8x1xf32>
    %52 = arith.cmpf oge, %50, %51 : vector<8x1xf32>
    %cst_23 = arith.constant 0.00999999977 : f32
    %53 = vector.broadcast %cst_23 : f32 to vector<8x1xf32>
    %54 = arith.mulf %53, %50 : vector<8x1xf32>
    %55 = arith.select %52, %50, %54 : vector<8x1xi1>, vector<8x1xf32>
    %cst_24 = arith.constant dense<0xFF800000> : vector<1xf32>
    %56 = vector.multi_reduction <maximumf>, %55, %cst_24 [0] : vector<8x1xf32> to vector<1xf32>
    %57 = vector.shape_cast %56 : vector<1xf32> to vector<1x1xf32>
    %c0_25 = arith.constant 0 : index
    %c0_26 = arith.constant 0 : index
    %58 = vector.load %arg10[%c0_25, %c0_26] : memref<1x1xf32, #tpu.memory_space<vmem>>, vector<1x1xf32>
    %59 = arith.maximumf %58, %57 : vector<1x1xf32>
    %c0_27 = arith.constant 0 : index
    %c0_28 = arith.constant 0 : index
    %60 = vector.load %arg10[%c0_27, %c0_28] : memref<1x1xf32, #tpu.memory_space<vmem>>, vector<1x1xf32>
    %61 = arith.subf %60, %59 : vector<1x1xf32>
    %62 = math.exp %61 : vector<1x1xf32>
    %63 = vector.broadcast %59 : vector<1x1xf32> to vector<8x1xf32>
    %64 = arith.subf %55, %63 : vector<8x1xf32>
    %65 = math.exp %64 : vector<8x1xf32>
    %c0_29 = arith.constant 0 : index
    %c0_30 = arith.constant 0 : index
    %66 = vector.load %arg11[%c0_29, %c0_30] : memref<1x1xf32, #tpu.memory_space<vmem>>, vector<1x1xf32>
    %67 = arith.mulf %62, %66 : vector<1x1xf32>
    %cst_31 = arith.constant dense<0.000000e+00> : vector<1xf32>
    %68 = vector.multi_reduction <add>, %65, %cst_31 [0] : vector<8x1xf32> to vector<1xf32>
    %69 = vector.shape_cast %68 : vector<1xf32> to vector<1x1xf32>
    %70 = arith.addf %67, %69 : vector<1x1xf32>
    %c0_32 = arith.constant 0 : index
    %c0_33 = arith.constant 0 : index
    %71 = vector.load %arg11[%c0_32, %c0_33] : memref<1x1xf32, #tpu.memory_space<vmem>>, vector<1x1xf32>
    tpu.vector_store %arg11[%c0_32, %c0_33], %70 {strides = array<i32>} : memref<1x1xf32, #tpu.memory_space<vmem>>, vector<1x1xf32>,
    %c0_34 = arith.constant 0 : index
    %c0_35 = arith.constant 0 : index
    %72 = vector.load %arg2[%c0_34, %c0_35] : memref<8x1xf32, #tpu.memory_space<vmem>>, vector<8x1xf32>
    %73 = arith.mulf %65, %72 : vector<8x1xf32>
    %c0_36 = arith.constant 0 : index
    %c0_37 = arith.constant 0 : index
    %74 = vector.load %arg12[%c0_36, %c0_37] : memref<1x32xf32, #tpu.memory_space<vmem>>, vector<1x32xf32>
    %75 = vector.broadcast %62 : vector<1x1xf32> to vector<1x32xf32>
    %76 = arith.mulf %75, %74 : vector<1x32xf32>
    %77 = vector.broadcast %73 : vector<8x1xf32> to vector<8x32xf32>
    %78 = arith.mulf %77, %3 : vector<8x32xf32>
    %cst_38 = arith.constant dense<0.000000e+00> : vector<32xf32>
    %79 = vector.multi_reduction <add>, %78, %cst_38 [0] : vector<8x32xf32> to vector<32xf32>
    %80 = vector.shape_cast %79 : vector<32xf32> to vector<1x32xf32>
    %81 = arith.addf %76, %80 : vector<1x32xf32>
    %c0_39 = arith.constant 0 : index
    %c0_40 = arith.constant 0 : index
    %82 = vector.load %arg12[%c0_39, %c0_40] : memref<1x32xf32, #tpu.memory_space<vmem>>, vector<1x32xf32>
    tpu.vector_store %arg12[%c0_39, %c0_40], %81 {strides = array<i32>} : memref<1x32xf32, #tpu.memory_space<vmem>>, vector<1x32xf32>,
    %c0_41 = arith.constant 0 : index
    %c0_42 = arith.constant 0 : index
    %83 = vector.load %arg10[%c0_41, %c0_42] : memref<1x1xf32, #tpu.memory_space<vmem>>, vector<1x1xf32>
    tpu.vector_store %arg10[%c0_41, %c0_42], %59 {strides = array<i32>} : memref<1x1xf32, #tpu.memory_space<vmem>>, vector<1x1xf32>,
    %c0_i32_43 = arith.constant 0 : i32
    %84 = arith.cmpi eq, %arg0, %c0_i32_43 : i32
    %85 = arith.extui %84 : i1 to i32
    %c0_i32_44 = arith.constant 0 : i32
    %86 = arith.cmpi ne, %85, %c0_i32_44 : i32
    scf.if %86 {
      %c0_45 = arith.constant 0 : index
      %c0_46 = arith.constant 0 : index
      %87 = vector.load %arg12[%c0_45, %c0_46] : memref<1x32xf32, #tpu.memory_space<vmem>>, vector<1x32xf32>
      %c0_47 = arith.constant 0 : index
      %c0_48 = arith.constant 0 : index
      %88 = vector.load %arg11[%c0_47, %c0_48] : memref<1x1xf32, #tpu.memory_space<vmem>>, vector<1x1xf32>
      %89 = vector.broadcast %88 : vector<1x1xf32> to vector<1x32xf32>
      %90 = arith.divf %87, %89 : vector<1x32xf32>
      %c0_49 = arith.constant 0 : index
      %c0_50 = arith.constant 0 : index
      %91 = vector.load %arg9[%c0_49, %c0_50] : memref<1x32xf32, #tpu.memory_space<vmem>>, vector<1x32xf32>
      tpu.vector_store %arg9[%c0_49, %c0_50], %90 {strides = array<i32>} : memref<1x32xf32, #tpu.memory_space<vmem>>, vector<1x32xf32>,
    } else {
    }
    return
  }
  func.func @transform_0(%arg0: i32) -> (i32, i32) {
    %c0_i32 = arith.constant 0 : i32
    %c0_i32_0 = arith.constant 0 : i32
    return %arg0, %c0_i32 : i32, i32
  }
  func.func @transform_1(%arg0: i32) -> (i32, i32) {
    %c0_i32 = arith.constant 0 : i32
    %c0_i32_0 = arith.constant 0 : i32
    return %arg0, %c0_i32 : i32, i32
  }
  func.func @transform_2(%arg0: i32) -> (i32, i32) {
    %c0_i32 = arith.constant 0 : i32
    %c0_i32_0 = arith.constant 0 : i32
    %c0_i32_1 = arith.constant 0 : i32
    return %c0_i32, %c0_i32_0 : i32, i32
  }
  func.func @transform_3(%arg0: i32) -> (i32, i32) {
    %c0_i32 = arith.constant 0 : i32
    %c0_i32_0 = arith.constant 0 : i32
    %c0_i32_1 = arith.constant 0 : i32
    return %c0_i32, %c0_i32_0 : i32, i32
  }
  func.func @transform_4(%arg0: i32) -> (i32, i32) {
    %c0_i32 = arith.constant 0 : i32
    %c0_i32_0 = arith.constant 0 : i32
    %c0_i32_1 = arith.constant 0 : i32
    return %c0_i32, %c0_i32_0 : i32, i32
  }
  func.func @transform_5(%arg0: i32) -> (i32, i32) {
    %c0_i32 = arith.constant 0 : i32
    %c0_i32_0 = arith.constant 0 : i32
    %c0_i32_1 = arith.constant 0 : i32
    return %c0_i32, %c0_i32_0 : i32, i32
  }
  func.func @transform_6(%arg0: i32) -> (i32, i32) {
    %c0_i32 = arith.constant 0 : i32
    %c0_i32_0 = arith.constant 0 : i32
    %c0_i32_1 = arith.constant 0 : i32
    return %c0_i32, %c0_i32_0 : i32, i32
  }
  func.func @transform_7(%arg0: i32) -> i32 {
    %c0_i32 = arith.constant 0 : i32
    %c0_i32_0 = arith.constant 0 : i32
    return %c0_i32 : i32
  }
  func.func @transform_8(%arg0: i32) -> (i32, i32) {
    %c0_i32 = arith.constant 0 : i32
    %c0_i32_0 = arith.constant 0 : i32
    %c0_i32_1 = arith.constant 0 : i32
    return %c0_i32, %c0_i32_0 : i32, i32
  }
}

</mosaic_0001>

<bundles_post_ra>
// kernel: tpu_custom_call.1
= control target key start
LH: loop header
LB: loop body
LE: loop exit
PB: predicated region body
PF: predicated region fallthrough
CT: control target
= control target key end

     0   :  { %14 = vsyncpa [#allocation7], 0  ;;  %s498_s0 = inlined_call_operand.vmem [shape: f32[8,32], index: 0, kind: input, shape index: {}]   ;;  %s499_s1 = inlined_call_operand.vmem [shape: f32[8,1], index: 1, kind: input, shape index: {}]   ;;  %s500_s2 = inlined_call_operand.hbm [shape: f32[32,32], index: 2, kind: input, shape index: {}]   ;;  %s501_s3 = inlined_call_operand.vmem [shape: f32[1,32], index: 3, kind: input, shape index: {}]   ;;  %s502_s4 = inlined_call_operand.vmem [shape: f32[1,32], index: 4, kind: input, shape index: {}]   ;;  %s503_s5 = inlined_call_operand.vmem [shape: f32[1,32], index: 5, kind: input, shape index: {}]   ;;  %s504_s6 = inlined_call_operand.vmem [shape: f32[1,32], index: 6, kind: input, shape index: {}]   ;;  %s505_s7 = inlined_call_operand.<no memory space> [shape: f32[1], index: 7, kind: input, shape index: {}]   ;;  %s506_s8 = inlined_call_operand.hbm [shape: f32[1,32], index: 8, kind: output, shape index: {}]  }
   0x1   :  { %15 = vsyncpa [#allocation8], 0  ;;  %s383_s27 = smov [#allocation6]   ;;  %s335_s9 = scalar_lea.hbm %s500_s2, 512 }
   0x2   :  { %s25_s28 = sshll.u32 %s383_s27, 4  ;;  %p336_p0 = scmp.ne.s32.totalorder %s500_s2, %s335_s9  ;;  %s26_s28 = int_to_ptr.vmem [resolvable:$true] %s25_s28 }
   0x3   :  { %p339_p1 = scmp.lt.u32.totalorder %s335_s9, %s500_s2 }
   0x5   :  { %p341_p2 = pnand %p339_p1, %p336_p0 }
   0x7   :  { %344 = shalt.err (!%p341_p2)
}
   0x8   :  { %s345_s14 = scalar_lea.vmem %s26_s28, 512  ;;  %p350_p4 = scmp.lt.s32.totalorder %s26_s28, %s26_s28 }
   0x9   :  { %p346_p3 = scmp.ne.s32.totalorder %s26_s28, %s345_s14  ;;  %p351_p5 = scmp.lt.s32.totalorder %s345_s14, %s345_s14 }
   0xb   :  { %p352_p6 = por %p351_p5, %p350_p4 }
   0xd   :  { %p353_p7 = pnand %p352_p6, %p346_p3 }
   0xf   :  { %356 = shalt.err (!%p353_p7)
}
  0x10   :  { %s384_s15 = smov 128   ;;  %s385_s16 = smov 8  }
  0x11   :  { %31 = dma.hbm_to_vmem [thread:$0]  %s500_s2, 512, %s26_s28, [#allocation7], %s384_s15, %s384_s15, %s385_s16  }
  0x12   :  { %379 = dma.done.wait [#allocation7], 512  }
  0x13   :  { %380 = vsyncadd [#allocation7], 4294966784  ;;  %vm49_vm0 = vcmask 0   ;;  %v386_v0 = vmov 0.0|0.0   ;;  %v387_v1 = vmov -inf   ;;  %v388_v2 = vmov 0.0  }
  0x14   :  { %308 = vmatprep.subr.bf16.mxu0 %v386_v0  ;;  %50 = vst.msk [vmem:[#allocation2] sm:$0x1] %vm49_vm0, %v387_v1  ;;  %51 = vst.msk [vmem:[#allocation3] sm:$0x1] %vm49_vm0, %v388_v2  ;;  %vm52_vm1 = vcmask 253952   ;;  %vm389_vm2 = vmmov 0   ;;  %v187_v38 = vstv %s505_s7  ;;  %v204_v44 = vlaneseq }
  0x15   :  { %53 = vst.msk [vmem:[#allocation4] sm:$0x1] %vm52_vm1, %v388_v2  ;;  %305 = vmatprep.mubr.msk.f32.mxu0 %vm389_vm2, %v388_v2  ;;  %v55_v3 = vld [vmem:[#allocation6] sm:$0xff]  ;;  %v56_v4 = vld [vmem:[#allocation6 + $0x8] sm:$0xff]  ;;  %v57_v5 = vld [vmem:[#allocation6 + $0x10] sm:$0xff]  ;;  %vm66_vm3 = vcmask 261120  }
  0x16   :  { %v309_v6 = vpack.c.bf16 %v56_v4, %v55_v3  ;;  %v58_v7 = vld [vmem:[#allocation6 + $0x18] sm:$0xff]  ;;  %v390_v37 = vmov 0   ;;  %v205_v47 = vshrl.u32 %v204_v44, 7  ;;  %vm214_vm5 = vcmask 7168  }
  0x17   :  { %v312_v8 = vpack.c.bf16 %v58_v7, %v57_v5  ;;  %v455_v9 = vld [vmem:[%s498_s0] sm:$0xff]  ;;  %324 = vset.pattern.permute.xlu0 %v390_v37  ;;  %323 = vset.pattern.permute.xlu1 %v390_v37 }
  0x18   :  { %310 = vmatpush3.bf16.msra.mxu0 %v309_v6  ;;  %v287_v10 = vld [vmem:[%s501_s3] ss:$0 sm:$0xff]  ;;  %v206_v51 = vsub.s32 0, %v205_v47 }
  0x19   :  { %311 = vmatprep.subr.bf16.mxu0 %v386_v0  ;;  %v289_v24 = vld [vmem:[%s502_s4] ss:$0 sm:$0xff] }
  0x1a   :  { %v290_v26 = vld [vmem:[%s503_s5] ss:$0 sm:$0xff] }
  0x1b   :  { %v291_v33 = vld [vmem:[%s504_s6] ss:$0 sm:$0xff]  ;;  %v212_v4 = vld [vmem:[#allocation3] sm:$0x1] }
  0x1c   :  { %313 = vmatpush3.bf16.msra.mxu0 %v312_v8  ;;  %v198_v50 = vld [vmem:[#allocation2] sm:$0x1] }
  0x1d   :  { %v225_v60 = vld [vmem:[%s499_s1] sm:$0xff]  ;;  %s391_s1 = smov [#allocation9]  }
  0x1e   :  { %s278_s26 = sshll.u32 %s391_s1, 4  ;;  %s279_s26 = int_to_ptr.vmem [resolvable:$true] %s278_s26 }
  0x1f   :  { %306 = vmatmul.mubr.msk.f32.vlgmr.msra.gmra.mrb[0].mxu0 %vm66_vm3, %v455_v9  ;;  %s357_s27 = scalar_lea.vmem %s279_s26, 16  ;;  %s361_s28 = scalar_lea.vmem %s279_s26, 32 }
  0x20   :  { %p358_p8 = scmp.ne.s32.totalorder %s279_s26, %s357_s27  ;;  %p362_p9 = scmp.lt.s32.totalorder %s279_s26, %s279_s26 }
  0x21   :  { %p363_p10 = scmp.lt.s32.totalorder %s361_s28, %s357_s27 }
  0x23   :  { %p364_p11 = por %p363_p10, %p362_p9 }
  0x25   :  { %p365_p12 = pnand %p364_p11, %p358_p8 }
  0xf2   :  { %v136_v11 = vpop.f32.mrb[0].mxu0 }
  0xf3   :  { %v137_v12 = vadd.f32 %v287_v10, %v136_v11  ;;  %v307_v13 = vpop.f32.mrb[1].mxu0 }
  0xf5   :  { %v140_v14 = vsel %vm66_vm3, %v137_v12, 0.0 }
  0xf6   :  { %141 = vadd.xlane.f32.xlu0 %v140_v14 }
 0x183   :  { %v142_v15 = vpop.xlane.xlu0 %141 }
 0x184   :  { %v144_v16 = vmul.f32 0.03125, %v142_v15 }
 0x186   :  { %v145_v17 = vsub.f32 %v137_v12, %v144_v16 }
 0x188   :  { %v146_v18 = vmul.f32 %v145_v17, %v145_v17 }
 0x18a   :  { %v147_v19 = vsel %vm66_vm3, %v146_v18, 0.0 }
 0x18b   :  { %148 = vadd.xlane.f32.xlu0 %v147_v19 }
 0x218   :  { %v149_v20 = vpop.xlane.xlu0 %148 }
 0x219   :  { %v150_v21 = vmul.f32 0.03125, %v149_v20  ;;  %v227_v20 = vld [vmem:[#allocation4] sm:$0x1] }
 0x21b   :  { %v151_v22 = vadd.f32 1e-05, %v150_v21 }
 0x21d   :  { %325 = vrsqrt.f32 %v151_v22 }
 0x227   :  { %v326_v23 = vpop.eup %325 }
 0x228   :  { %v153_v25 = vmul.f32 %v326_v23, %v145_v17 }
 0x22a   :  { %v161_v27 = vmul.f32 %v289_v24, %v153_v25 }
 0x22c   :  { %v169_v28 = vadd.f32 %v290_v26, %v161_v27 }
 0x22e   :  { %v171_v29 = vmul.f32 0.70710677, %v169_v28  ;;  %v170_v31 = vmul.f32 0.5, %v169_v28 }
 0x230   :  { %327 = verf.f32 %v171_v29 }
 0x23a   :  { %v328_v30 = vpop.eup %327 }
 0x23b   :  { %v173_v32 = vadd.f32 1.0, %v328_v30 }
 0x23d   :  { %v174_v34 = vmul.f32 %v173_v32, %v170_v31 }
 0x23f   :  { %v182_v35 = vmul.f32 %v291_v33, %v174_v34 }
 0x241   :  { %v183_v36 = vsel %vm66_vm3, %v182_v35, 0.0 }
 0x242   :  { %184 = vadd.xlane.f32.xlu1 %v183_v36 }
 0x2cf   :  { %v185_v39 = vpop.xlane.xlu1 %184 }
 0x2d0   :  { %v188_v40 = vadd.f32 %v187_v38, %v185_v39 }
 0x2d2   :  { %vm189_vm4 = vcmp.ge.f32.partialorder %v188_v40, 0.0  ;;  %v190_v41 = vmul.f32 0.01, %v188_v40 }
 0x2d4   :  { %v191_v42 = vsel %vm189_vm4, %v188_v40, %v190_v41 }
 0x2d5   :  { %v192_v43 = vrot.slane %v191_v42, 4 }
 0x2d7   :  { %v193_v45 = vmax.f32 %v191_v42, %v192_v43 }
 0x2d9   :  { %v194_v46 = vrot.slane %v193_v45, 2 }
 0x2db   :  { %v195_v48 = vmax.f32 %v193_v45, %v194_v46 }
 0x2dd   :  { %v196_v49 = vrot.slane %v195_v48, 1 }
 0x2df   :  { %v197_v52 = vmax.f32 %v195_v48, %v196_v49 }
 0x2e1   :  { %v199_v53 = vmax.f32 %v198_v50, %v197_v52 }
 0x2e3   :  { %v200_v54 = vsub.f32 %v198_v50, %v199_v53  ;;  %v207_v55 = vrot.slane %v199_v53, %v206_v51  ;;  %254 = vst.msk [vmem:[#allocation2] sm:$0x1] %vm49_vm0, %v199_v53 }
 0x2e5   :  { %v201_v56 = vmul.f32 1.442695, %v200_v54  ;;  %v209_v57 = vsub.f32 %v191_v42, %v207_v55 }
 0x2e7   :  { %329 = vpow2.f32 %v201_v56  ;;  %v210_v58 = vmul.f32 1.442695, %v209_v57 }
 0x2e9   :  { %331 = vpow2.f32 %v210_v58 }
 0x2f1   :  { %v330_v59 = vpop.eup %329 }
 0x2f2   :  { %230 = vperm.xlu0 %324, %v330_v59   ;;  %v213_v6 = vmul.f32 %v330_v59, %v212_v4 }
 0x2f3   :  { %v332_v61 = vpop.eup %331 }
 0x2f4   :  { %v215_v62 = vsel %vm214_vm5, %v332_v61, 0.0  ;;  %v226_v63 = vmul.f32 %v332_v61, %v225_v60 }
 0x2f5   :  { %v216_v0 = vrot.slane %v215_v62, 4 }
 0x2f6   :  { %240 = vperm.xlu1 %323, %v226_v63  }
 0x2f7   :  { %v217_v1 = vadd.f32 %v216_v0, %v215_v62 }
 0x2f9   :  { %v218_v2 = vrot.slane %v217_v1, 2 }
 0x2fb   :  { %v219_v3 = vadd.f32 %v218_v2, %v217_v1 }
 0x2fd   :  { %v220_v5 = vrot.slane %v219_v3, 1 }
 0x2ff   :  { %v221_v7 = vadd.f32 %v220_v5, %v219_v3 }
 0x301   :  { %v222_v8 = vadd.f32 %v221_v7, %v213_v6 }
 0x303   :  { %224 = vst.msk [vmem:[#allocation3] sm:$0x1] %vm49_vm0, %v222_v8 }
 0x30a   :  { %v259_v10 = vld [vmem:[#allocation3] sm:$0x1] }
 0x30b   :  { %262 = vperm.xlu1 %323, %v259_v10  }
 0x371   :  { %v231_v16 = vpop.permute.xlu0 %230 }
 0x372   :  { %v236_v18 = vrot.slane %v231_v16, %v206_v51 }
 0x374   :  { %v237_v22 = vmul.f32 %v236_v18, %v227_v20 }
 0x375   :  { %v241_v11 = vpop.permute.xlu1 %240 }
 0x376   :  { %v243_v12 = vmul.f32 %v241_v11, %v455_v9 }
 0x378   :  { %v244_v13 = vsel %vm66_vm3, %v243_v12, 0.0 }
 0x379   :  { %v245_v14 = vrot.slane %v244_v13, 4 }
 0x37b   :  { %v246_v15 = vadd.f32 %v245_v14, %v244_v13 }
 0x37d   :  { %v247_v17 = vrot.slane %v246_v15, 2 }
 0x37f   :  { %v248_v19 = vadd.f32 %v247_v17, %v246_v15 }
 0x381   :  { %v249_v21 = vrot.slane %v248_v19, 1 }
 0x383   :  { %v250_v23 = vadd.f32 %v249_v21, %v248_v19 }
 0x385   :  { %v251_v24 = vadd.f32 %v250_v23, %v237_v22 }
 0x387   :  { %253 = vst.msk [vmem:[#allocation4] sm:$0x1] %vm52_vm1, %v251_v24 }
 0x38a   :  { %v263_v25 = vpop.permute.xlu1 %262 }
 0x38b   :  { %v268_v26 = vrot.slane %v263_v25, %v206_v51 }
 0x38d   :  { %333 = vrcp.f32 %v268_v26 }
 0x38e   :  { %v258_v27 = vld [vmem:[#allocation4] sm:$0x1] }
 0x397   :  { %v334_v9 = vpop.eup %333 }
 0x398   :  { %v270_v28 = vmul.f32 %v334_v9, %v258_v27 }
 0x39a   :  { %271 = vst.msk [vmem:[#allocation9] sm:$0x1] %vm52_vm1, %v270_v28 }
 0x39b   :  { %368 = shalt.err (!%p365_p12)
}
 0x39c   :  { %s369_s9 = scalar_lea.hbm %s506_s8, 16 }
 0x39d   :  { %p370_p13 = scmp.ne.s32.totalorder %s506_s8, %s369_s9  ;;  %p373_p0 = scmp.lt.u32.totalorder %s369_s9, %s506_s8 }
 0x39f   :  { %p375_p1 = pnand %p373_p0, %p370_p13 }
 0x3a1   :  { %378 = shalt.err (!%p375_p1)
}
 0x3a2   :  { %281 = dma.vmem_to_hbm [thread:$0]  %s279_s26, 16, %s506_s8, [#allocation8]  }
 0x3a3   :  { %381 = dma.done.wait [#allocation8], 16  }
 0x3a4   :  { %382 = vsyncadd [#allocation8], 4294967280 }
 0x3a5   :  { %285 = vsyncpa [#allocation7], 1 }
 0x3a6   :  { %286 = vsyncpa [#allocation8], 1 }

</bundles_post_ra>
